<compile_context>
chip_gen: v7x
topology: tpu7x:2x2x1
jax: 0.10.0
libtpu: 0.0.40
codegen_flags: <defaults>
</compile_context>

<pallas_src>
import functools

import jax
import jax.numpy as jnp
from jax.experimental import pallas as pl
from jax.experimental.pallas import tpu as pltpu


def _round_up(x: int, m: int) -> int:
    return (x + m - 1) // m * m


def _error_correction_kernel(
    state_ref, rand_ref,
    dw1_ref, db1_ref, dw2_ref, db2_ref,        # error_detector params
    cw1_ref, cb1_ref, lng_ref, lnb_ref,        # correction_net: lin1 + LayerNorm
    cw2_ref, cb2_ref,                          # correction_net: lin2
    out_ref, prob_ref, nan_ref,
    *, hidden_dim,
):
    f32 = jnp.float32
    TB, HP = state_ref.shape
    H = hidden_dim

    state = state_ref[...]                                          # (TB, HP) f32
    nan_mask = jnp.isnan(state)
    nan_f = nan_mask.astype(f32)
    row_in_nan = jnp.max(nan_f, axis=-1, keepdims=True)             # (TB, 1)

    # Lane mask: real hidden lanes (< H). Padded lanes of `state` are zeros.
    lane_idx = jax.lax.broadcasted_iota(jnp.int32, (TB, HP), 1)
    lane_valid = lane_idx < H
    lane_valid_f = lane_valid.astype(f32)

    working = jnp.where(nan_mask, 0.0, state)                       # f32
    working_mm = working.astype(jnp.bfloat16)                       # MXU operand

    # ---- error_detector: Linear(H, H//2) -> ReLU -> Linear(H//2, 1) -> Sigmoid ----
    h1 = jnp.dot(working_mm, dw1_ref[...],
                 preferred_element_type=f32) + db1_ref[...]
    h1 = jnp.maximum(h1, 0.0)
    # Second layer has out_features = 1 -> lane-reduction instead of a matmul.
    logits = jnp.sum(h1 * dw2_ref[...], axis=-1, keepdims=True) + db2_ref[...]
    # Numerically-stable sigmoid (no exp overflow for very negative logits).
    z = jnp.exp(-jnp.abs(logits))
    inv = 1.0 / (1.0 + z)
    prob_ref[...] = jnp.where(logits >= 0.0, inv, z * inv)          # (TB, 1)

    # ---- correction_net: Linear -> ReLU -> LayerNorm -> Linear -> Tanh ----
    c1 = jnp.dot(working_mm, cw1_ref[...],
                 preferred_element_type=f32) + cb1_ref[...]
    c1 = jnp.maximum(c1, 0.0)
    inv_h = 1.0 / H
    mu = jnp.sum(c1 * lane_valid_f, axis=-1, keepdims=True) * inv_h
    cen = c1 - mu
    var = jnp.sum(cen * cen * lane_valid_f, axis=-1, keepdims=True) * inv_h
    # Padded lanes: gamma = beta = 0 -> ln == 0 there.
    ln = cen * jax.lax.rsqrt(var + 1e-5) * lng_ref[...] + lnb_ref[...]
    corrected = jnp.tanh(
        jnp.dot(ln.astype(jnp.bfloat16), cw2_ref[...],
                preferred_element_type=f32) + cb2_ref[...])         # (TB, HP)

    # ---- per-row NaN fill: NaN positions <- mean of corrected at valid positions,
    #      or randn*0.1 if the entire row was NaN.
    # TODO(synk): optionally gate this block with @pl.when(any NaN in tile) and draw
    #             the randn fallback in-kernel via pltpu.prng_* to skip the rand DMA.
    valid = jnp.logical_and(jnp.logical_not(nan_mask), lane_valid)
    valid_f = valid.astype(f32)
    valid_cnt = jnp.sum(valid_f, axis=-1, keepdims=True)
    valid_sum = jnp.sum(jnp.where(valid, corrected, 0.0), axis=-1, keepdims=True)
    valid_mean = valid_sum / jnp.maximum(valid_cnt, 1.0)
    fill = jnp.where(valid_cnt > 0.0, valid_mean, rand_ref[...])
    corrected = jnp.where(nan_mask, fill, corrected)

    # ---- clamp(-1, 1), then F.normalize(dim=-1): x * rsqrt(max(sum x^2, 1e-24)) ----
    corrected = jnp.clip(corrected, -1.0, 1.0)
    sumsq = jnp.sum(corrected * corrected, axis=-1, keepdims=True)
    corrected = corrected * jax.lax.rsqrt(jnp.maximum(sumsq, 1e-24))

    # ---- final NaN scrub + per-row NaN flag (input or output) ----
    out_nan = jnp.isnan(corrected)
    row_out_nan = jnp.max(out_nan.astype(f32), axis=-1, keepdims=True)
    corrected = jnp.where(out_nan, 0.0, corrected)

    out_ref[...] = corrected
    nan_ref[...] = jnp.maximum(row_in_nan, row_out_nan)


def init_params(key, hidden_dim):
    """PyTorch-default-style init: U(-1/sqrt(fan_in), 1/sqrt(fan_in)). Weights (in, out)."""
    h = hidden_dim
    h2 = hidden_dim // 2
    keys = jax.random.split(key, 8)

    def lin(k, fan_in, shape):
        bound = 1.0 / (fan_in ** 0.5)
        return jax.random.uniform(k, shape, jnp.float32, -bound, bound)

    return dict(
        # error_detector
        dw1=lin(keys[0], h, (h, h2)),
        db1=lin(keys[1], h, (1, h2)),
        dw2=lin(keys[2], h2, (1, h2)),          # Linear(h2 -> 1) as a row vector
        db2=lin(keys[3], h2, (1, 1)),
        # correction_net
        cw1=lin(keys[4], h, (h, h)),
        cb1=lin(keys[5], h, (1, h)),
        lng=jnp.ones((1, h), jnp.float32),
        lnb=jnp.zeros((1, h), jnp.float32),
        cw2=lin(keys[6], h, (h, h)),
        cb2=lin(keys[7], h, (1, h)),
    )


def prepare_params(params, hidden_dim):
    """Zero-pad every parameter to lane-dense (multiple-of-128) shapes and cast the
    MXU weight operands to bf16. Do this ONCE, outside the per-step call."""
    h = hidden_dim
    h2 = hidden_dim // 2
    hp = _round_up(h, 128)
    h2p = _round_up(h2, 128)

    def pad2(x, rows, cols):
        return jnp.pad(x, ((0, rows - x.shape[0]), (0, cols - x.shape[1])))

    return dict(
        dw1=pad2(params["dw1"], hp, h2p).astype(jnp.bfloat16),
        db1=pad2(params["db1"], 1, h2p),
        dw2=pad2(params["dw2"], 1, h2p),
        db2=params["db2"],
        cw1=pad2(params["cw1"], hp, hp).astype(jnp.bfloat16),
        cb1=pad2(params["cb1"], 1, hp),
        lng=pad2(params["lng"], 1, hp),          # padded lanes: gamma = 0
        lnb=pad2(params["lnb"], 1, hp),          # padded lanes: beta  = 0
        cw2=pad2(params["cw2"], hp, hp).astype(jnp.bfloat16),
        cb2=pad2(params["cb2"], 1, hp),
    )


@functools.partial(jax.jit, static_argnames=("block_b",))
def error_correction_forward(state, padded_params, rand_key, block_b=128):
    """Returns (corrected_state (B, H), error_prob scalar)."""
    B, H = state.shape
    HP = _round_up(H, 128)
    H2P = _round_up(H // 2, 128)
    TB = min(block_b, _round_up(B, 8))
    BP = _round_up(B, TB)
    grid = (BP // TB,)

    state_p = jnp.pad(state.astype(jnp.float32), ((0, BP - B), (0, HP - H)))
    # randn * 0.1 fallback (only consumed where an entire input row is NaN).
    rand_p = 0.1 * jax.random.normal(rand_key, (BP, HP), jnp.float32)

    p = padded_params

    def row_spec(shape):
        return pl.BlockSpec(shape, lambda i: (i, 0))

    def w_spec(shape):          # constant index map -> weight stays VMEM-resident
        return pl.BlockSpec(shape, lambda i: (0, 0))

    # VMEM budget: resident weights + double-buffered activation/output tiles.
    weight_bytes = sum(int(x.size) * x.dtype.itemsize for x in p.values())
    act_bytes = 2 * 2 * (TB * HP * 4)                 # state + rand, double-buffered
    out_bytes = 2 * (TB * HP * 4 + 2 * TB * 4)        # corrected + prob + nan flag
    vmem_limit = min(max(2 * (weight_bytes + act_bytes + out_bytes) + (4 << 20),
                         32 * 1024 * 1024),
                     64 * 1024 * 1024)                # v7x-safe cap

    kernel = functools.partial(_error_correction_kernel, hidden_dim=H)

    corrected_p, probs_p, nanflag_p = pl.pallas_call(
        kernel,
        grid=grid,
        in_specs=[
            row_spec((TB, HP)),          # state
            row_spec((TB, HP)),          # rand fill
            w_spec((HP, H2P)),           # dw1 (bf16)
            w_spec((1, H2P)),            # db1
            w_spec((1, H2P)),            # dw2
            w_spec((1, 1)),              # db2
            w_spec((HP, HP)),            # cw1 (bf16)
            w_spec((1, HP)),             # cb1
            w_spec((1, HP)),             # ln gamma
            w_spec((1, HP)),             # ln beta
            w_spec((HP, HP)),            # cw2 (bf16)
            w_spec((1, HP)),             # cb2
        ],
        out_specs=(
            row_spec((TB, HP)),          # corrected state (lane-dense)
            row_spec((TB, 1)),           # per-row detector prob
            row_spec((TB, 1)),           # per-row NaN flag
        ),
        out_shape=(
            jax.ShapeDtypeStruct((BP, HP), jnp.float32),
            jax.ShapeDtypeStruct((BP, 1), jnp.float32),
            jax.ShapeDtypeStruct((BP, 1), jnp.float32),
        ),
        compiler_params=pltpu.CompilerParams(
            dimension_semantics=("parallel",),
            vmem_limit_bytes=int(vmem_limit),
        ),
    )(
        state_p, rand_p,
        p["dw1"], p["db1"], p["dw2"], p["db2"],
        p["cw1"], p["cb1"], p["lng"], p["lnb"],
        p["cw2"], p["cb2"],
    )

    corrected = corrected_p[:B, :H]
    det_prob = jnp.mean(probs_p[:B, 0])
    any_nan = jnp.max(nanflag_p[:B, 0]) > 0.0
    error_prob = jnp.where(any_nan, jnp.float32(1.0), det_prob)
    return corrected, error_prob


if __name__ == "__main__":
    hidden_dim = 32
    batch = 8

    key = jax.random.PRNGKey(0)
    k_param, k_state, k_rand = jax.random.split(key, 3)

    params = init_params(k_param, hidden_dim)
    pparams = prepare_params(params, hidden_dim)
    state = jax.random.normal(k_state, (batch, hidden_dim), jnp.float32)

    # Clean path
    corrected, error_prob = error_correction_forward(state, pparams, k_rand)
    corrected, error_prob = jax.block_until_ready((corrected, error_prob))

    assert corrected.shape == (batch, hidden_dim)
    assert not bool(jnp.isnan(corrected).any())
    norms = jnp.sqrt(jnp.sum(corrected * corrected, axis=-1))
    assert bool(jnp.all(jnp.abs(norms - 1.0) < 1e-3))
    assert 0.0 <= float(error_prob) <= 1.0

    # NaN path: partially-NaN row gets the valid-mean fill, error_prob forced to 1.0
    state_nan = state.at[1, :5].set(jnp.nan)
    corrected_nan, prob_nan = error_correction_forward(state_nan, pparams, k_rand)
    corrected_nan, prob_nan = jax.block_until_ready((corrected_nan, prob_nan))
    assert not bool(jnp.isnan(corrected_nan).any())
    assert abs(float(prob_nan) - 1.0) < 1e-6

    print("KERNEL_OK")
</pallas_src>

<mosaic_0001>
module attributes {stable_mosaic.version = 11 : i64} {
  func.func @_error_correction_kernel(%arg0: i32, %arg1: memref<8x128xf32, #tpu.memory_space<vmem>>, %arg2: memref<8x128xf32, #tpu.memory_space<vmem>>, %arg3: memref<128x128xbf16, #tpu.memory_space<vmem>>, %arg4: memref<1x128xf32, #tpu.memory_space<vmem>>, %arg5: memref<1x128xf32, #tpu.memory_space<vmem>>, %arg6: memref<1x1xf32, #tpu.memory_space<vmem>>, %arg7: memref<128x128xbf16, #tpu.memory_space<vmem>>, %arg8: memref<1x128xf32, #tpu.memory_space<vmem>>, %arg9: memref<1x128xf32, #tpu.memory_space<vmem>>, %arg10: memref<1x128xf32, #tpu.memory_space<vmem>>, %arg11: memref<128x128xbf16, #tpu.memory_space<vmem>>, %arg12: memref<1x128xf32, #tpu.memory_space<vmem>>, %arg13: memref<8x128xf32, #tpu.memory_space<vmem>>, %arg14: memref<8x1xf32, #tpu.memory_space<vmem>>, %arg15: memref<8x1xf32, #tpu.memory_space<vmem>>) attributes {dimension_semantics = [#tpu.dimension_semantics<parallel>], iteration_bounds = array<i64: 1>, scalar_prefetch = 0 : i64, scratch_operands = 0 : i64, tpu.core_type = #tpu.core_type<tc>, window_params = [{transform_indices = @transform_0, window_bounds = array<i64: 8, 128>}, {transform_indices = @transform_1, window_bounds = array<i64: 8, 128>}, {pipeline_mode = #tpu.pipeline_mode<synchronous>, transform_indices = @transform_2, window_bounds = array<i64: 128, 128>}, {pipeline_mode = #tpu.pipeline_mode<synchronous>, transform_indices = @transform_3, window_bounds = array<i64: 1, 128>}, {pipeline_mode = #tpu.pipeline_mode<synchronous>, transform_indices = @transform_4, window_bounds = array<i64: 1, 128>}, {pipeline_mode = #tpu.pipeline_mode<synchronous>, transform_indices = @transform_5, window_bounds = array<i64: 1, 1>}, {pipeline_mode = #tpu.pipeline_mode<synchronous>, transform_indices = @transform_6, window_bounds = array<i64: 128, 128>}, {pipeline_mode = #tpu.pipeline_mode<synchronous>, transform_indices = @transform_7, window_bounds = array<i64: 1, 128>}, {pipeline_mode = #tpu.pipeline_mode<synchronous>, transform_indices = @transform_8, window_bounds = array<i64: 1, 128>}, {pipeline_mode = #tpu.pipeline_mode<synchronous>, transform_indices = @transform_9, window_bounds = array<i64: 1, 128>}, {pipeline_mode = #tpu.pipeline_mode<synchronous>, transform_indices = @transform_10, window_bounds = array<i64: 128, 128>}, {pipeline_mode = #tpu.pipeline_mode<synchronous>, transform_indices = @transform_11, window_bounds = array<i64: 1, 128>}, {transform_indices = @transform_12, window_bounds = array<i64: 8, 128>}, {transform_indices = @transform_13, window_bounds = array<i64: 8, 1>}, {transform_indices = @transform_14, window_bounds = array<i64: 8, 1>}]} {
    %c0 = arith.constant 0 : index
    %c0_0 = arith.constant 0 : index
    %0 = vector.load %arg1[%c0, %c0_0] : memref<8x128xf32, #tpu.memory_space<vmem>>, vector<8x128xf32>
    %1 = arith.cmpf one, %0, %0 : vector<8x128xf32>
    %2 = arith.extui %1 : vector<8x128xi1> to vector<8x128xi32>
    %3 = arith.sitofp %2 : vector<8x128xi32> to vector<8x128xf32>
    %cst = arith.constant dense<0xFF800000> : vector<8xf32>
    %4 = vector.multi_reduction <maximumf>, %3, %cst [1] : vector<8x128xf32> to vector<8xf32>
    %5 = vector.shape_cast %4 : vector<8xf32> to vector<8x1xf32>
    %6 = tpu.iota {dimensions = array<i32: 1>} : vector<8x128xi32>
    %c32_i32 = arith.constant 32 : i32
    %7 = vector.broadcast %c32_i32 : i32 to vector<8x128xi32>
    %8 = arith.cmpi slt, %6, %7 : vector<8x128xi32>
    %9 = arith.extui %8 : vector<8x128xi1> to vector<8x128xi32>
    %10 = arith.sitofp %9 : vector<8x128xi32> to vector<8x128xf32>
    %cst_1 = arith.constant 0.000000e+00 : f32
    %11 = vector.broadcast %cst_1 : f32 to vector<8x128xf32>
    %12 = arith.select %1, %11, %0 : vector<8x128xi1>, vector<8x128xf32>
    %13 = arith.truncf %12 : vector<8x128xf32> to vector<8x128xbf16>
    %c0_2 = arith.constant 0 : index
    %c0_3 = arith.constant 0 : index
    %14 = vector.load %arg3[%c0_2, %c0_3] : memref<128x128xbf16, #tpu.memory_space<vmem>>, vector<128x128xbf16>
    %cst_4 = arith.constant dense<0.000000e+00> : vector<8x128xf32>
    %15 = tpu.matmul %13, %14, %cst_4 {dimension_numbers = #tpu.dot_dimension_numbers<[1], [0], [0], [1], [0, 0, 1, 1], [], []>} : vector<8x128xbf16>, vector<128x128xbf16>, vector<8x128xf32> -> vector<8x128xf32>
    %c0_5 = arith.constant 0 : index
    %c0_6 = arith.constant 0 : index
    %16 = vector.load %arg4[%c0_5, %c0_6] : memref<1x128xf32, #tpu.memory_space<vmem>>, vector<1x128xf32>
    %17 = vector.broadcast %16 : vector<1x128xf32> to vector<8x128xf32>
    %18 = arith.addf %15, %17 : vector<8x128xf32>
    %cst_7 = arith.constant 0.000000e+00 : f32
    %19 = vector.broadcast %cst_7 : f32 to vector<8x128xf32>
    %20 = arith.maximumf %18, %19 : vector<8x128xf32>
    %c0_8 = arith.constant 0 : index
    %c0_9 = arith.constant 0 : index
    %21 = vector.load %arg5[%c0_8, %c0_9] : memref<1x128xf32, #tpu.memory_space<vmem>>, vector<1x128xf32>
    %22 = vector.broadcast %21 : vector<1x128xf32> to vector<8x128xf32>
    %23 = arith.mulf %20, %22 : vector<8x128xf32>
    %cst_10 = arith.constant dense<0.000000e+00> : vector<8xf32>
    %24 = vector.multi_reduction <add>, %23, %cst_10 [1] : vector<8x128xf32> to vector<8xf32>
    %25 = vector.shape_cast %24 : vector<8xf32> to vector<8x1xf32>
    %c0_11 = arith.constant 0 : index
    %c0_12 = arith.constant 0 : index
    %26 = vector.load %arg6[%c0_11, %c0_12] : memref<1x1xf32, #tpu.memory_space<vmem>>, vector<1x1xf32>
    %27 = vector.broadcast %26 : vector<1x1xf32> to vector<8x1xf32>
    %28 = arith.addf %25, %27 : vector<8x1xf32>
    %29 = math.absf %28 : vector<8x1xf32>
    %cst_13 = arith.constant 0.000000e+00 : f32
    %30 = vector.broadcast %cst_13 : f32 to vector<8x1xf32>
    %31 = arith.subf %30, %29 : vector<8x1xf32>
    %32 = math.exp %31 : vector<8x1xf32>
    %cst_14 = arith.constant 1.000000e+00 : f32
    %33 = vector.broadcast %cst_14 : f32 to vector<8x1xf32>
    %34 = arith.addf %33, %32 : vector<8x1xf32>
    %cst_15 = arith.constant 1.000000e+00 : f32
    %35 = vector.broadcast %cst_15 : f32 to vector<8x1xf32>
    %36 = arith.divf %35, %34 : vector<8x1xf32>
    %cst_16 = arith.constant 0.000000e+00 : f32
    %37 = vector.broadcast %cst_16 : f32 to vector<8x1xf32>
    %38 = arith.cmpf oge, %28, %37 : vector<8x1xf32>
    %39 = arith.mulf %32, %36 : vector<8x1xf32>
    %40 = arith.select %38, %36, %39 : vector<8x1xi1>, vector<8x1xf32>
    %c0_17 = arith.constant 0 : index
    %c0_18 = arith.constant 0 : index
    %41 = vector.load %arg14[%c0_17, %c0_18] : memref<8x1xf32, #tpu.memory_space<vmem>>, vector<8x1xf32>
    tpu.vector_store %arg14[%c0_17, %c0_18], %40 {strides = array<i32>} : memref<8x1xf32, #tpu.memory_space<vmem>>, vector<8x1xf32>,
    %c0_19 = arith.constant 0 : index
    %c0_20 = arith.constant 0 : index
    %42 = vector.load %arg7[%c0_19, %c0_20] : memref<128x128xbf16, #tpu.memory_space<vmem>>, vector<128x128xbf16>
    %cst_21 = arith.constant dense<0.000000e+00> : vector<8x128xf32>
    %43 = tpu.matmul %13, %42, %cst_21 {dimension_numbers = #tpu.dot_dimension_numbers<[1], [0], [0], [1], [0, 0, 1, 1], [], []>} : vector<8x128xbf16>, vector<128x128xbf16>, vector<8x128xf32> -> vector<8x128xf32>
    %c0_22 = arith.constant 0 : index
    %c0_23 = arith.constant 0 : index
    %44 = vector.load %arg8[%c0_22, %c0_23] : memref<1x128xf32, #tpu.memory_space<vmem>>, vector<1x128xf32>
    %45 = vector.broadcast %44 : vector<1x128xf32> to vector<8x128xf32>
    %46 = arith.addf %43, %45 : vector<8x128xf32>
    %cst_24 = arith.constant 0.000000e+00 : f32
    %47 = vector.broadcast %cst_24 : f32 to vector<8x128xf32>
    %48 = arith.maximumf %46, %47 : vector<8x128xf32>
    %49 = arith.mulf %48, %10 : vector<8x128xf32>
    %cst_25 = arith.constant dense<0.000000e+00> : vector<8xf32>
    %50 = vector.multi_reduction <add>, %49, %cst_25 [1] : vector<8x128xf32> to vector<8xf32>
    %51 = vector.shape_cast %50 : vector<8xf32> to vector<8x1xf32>
    %cst_26 = arith.constant 3.125000e-02 : f32
    %52 = vector.broadcast %cst_26 : f32 to vector<8x1xf32>
    %53 = arith.mulf %51, %52 : vector<8x1xf32>
    %54 = vector.broadcast %53 : vector<8x1xf32> to vector<8x128xf32>
    %55 = arith.subf %48, %54 : vector<8x128xf32>
    %56 = arith.mulf %55, %55 : vector<8x128xf32>
    %57 = arith.mulf %56, %10 : vector<8x128xf32>
    %cst_27 = arith.constant dense<0.000000e+00> : vector<8xf32>
    %58 = vector.multi_reduction <add>, %57, %cst_27 [1] : vector<8x128xf32> to vector<8xf32>
    %59 = vector.shape_cast %58 : vector<8xf32> to vector<8x1xf32>
    %cst_28 = arith.constant 3.125000e-02 : f32
    %60 = vector.broadcast %cst_28 : f32 to vector<8x1xf32>
    %61 = arith.mulf %59, %60 : vector<8x1xf32>
    %cst_29 = arith.constant 9.99999974E-6 : f32
    %62 = vector.broadcast %cst_29 : f32 to vector<8x1xf32>
    %63 = arith.addf %61, %62 : vector<8x1xf32>
    %64 = math.rsqrt %63 : vector<8x1xf32>
    %65 = vector.broadcast %64 : vector<8x1xf32> to vector<8x128xf32>
    %66 = arith.mulf %55, %65 : vector<8x128xf32>
    %c0_30 = arith.constant 0 : index
    %c0_31 = arith.constant 0 : index
    %67 = vector.load %arg9[%c0_30, %c0_31] : memref<1x128xf32, #tpu.memory_space<vmem>>, vector<1x128xf32>
    %68 = vector.broadcast %67 : vector<1x128xf32> to vector<8x128xf32>
    %69 = arith.mulf %66, %68 : vector<8x128xf32>
    %c0_32 = arith.constant 0 : index
    %c0_33 = arith.constant 0 : index
    %70 = vector.load %arg10[%c0_32, %c0_33] : memref<1x128xf32, #tpu.memory_space<vmem>>, vector<1x128xf32>
    %71 = vector.broadcast %70 : vector<1x128xf32> to vector<8x128xf32>
    %72 = arith.addf %69, %71 : vector<8x128xf32>
    %73 = arith.truncf %72 : vector<8x128xf32> to vector<8x128xbf16>
    %c0_34 = arith.constant 0 : index
    %c0_35 = arith.constant 0 : index
    %74 = vector.load %arg11[%c0_34, %c0_35] : memref<128x128xbf16, #tpu.memory_space<vmem>>, vector<128x128xbf16>
    %cst_36 = arith.constant dense<0.000000e+00> : vector<8x128xf32>
    %75 = tpu.matmul %73, %74, %cst_36 {dimension_numbers = #tpu.dot_dimension_numbers<[1], [0], [0], [1], [0, 0, 1, 1], [], []>} : vector<8x128xbf16>, vector<128x128xbf16>, vector<8x128xf32> -> vector<8x128xf32>
    %c0_37 = arith.constant 0 : index
    %c0_38 = arith.constant 0 : index
    %76 = vector.load %arg12[%c0_37, %c0_38] : memref<1x128xf32, #tpu.memory_space<vmem>>, vector<1x128xf32>
    %77 = vector.broadcast %76 : vector<1x128xf32> to vector<8x128xf32>
    %78 = arith.addf %75, %77 : vector<8x128xf32>
    %79 = math.tanh %78 : vector<8x128xf32>
    %cst_39 = arith.constant dense<true> : vector<8x128xi1>
    %80 = arith.xori %1, %cst_39 : vector<8x128xi1>
    %81 = arith.andi %80, %8 : vector<8x128xi1>
    %82 = arith.extui %81 : vector<8x128xi1> to vector<8x128xi32>
    %83 = arith.sitofp %82 : vector<8x128xi32> to vector<8x128xf32>
    %cst_40 = arith.constant dense<0.000000e+00> : vector<8xf32>
    %84 = vector.multi_reduction <add>, %83, %cst_40 [1] : vector<8x128xf32> to vector<8xf32>
    %85 = vector.shape_cast %84 : vector<8xf32> to vector<8x1xf32>
    %cst_41 = arith.constant 0.000000e+00 : f32
    %86 = vector.broadcast %cst_41 : f32 to vector<8x128xf32>
    %87 = arith.select %81, %79, %86 : vector<8x128xi1>, vector<8x128xf32>
    %cst_42 = arith.constant dense<0.000000e+00> : vector<8xf32>
    %88 = vector.multi_reduction <add>, %87, %cst_42 [1] : vector<8x128xf32> to vector<8xf32>
    %89 = vector.shape_cast %88 : vector<8xf32> to vector<8x1xf32>
    %cst_43 = arith.constant 1.000000e+00 : f32
    %90 = vector.broadcast %cst_43 : f32 to vector<8x1xf32>
    %91 = arith.maximumf %85, %90 : vector<8x1xf32>
    %92 = arith.divf %89, %91 : vector<8x1xf32>
    %cst_44 = arith.constant 0.000000e+00 : f32
    %93 = vector.broadcast %cst_44 : f32 to vector<8x1xf32>
    %94 = arith.cmpf ogt, %85, %93 : vector<8x1xf32>
    %c0_45 = arith.constant 0 : index
    %c0_46 = arith.constant 0 : index
    %95 = vector.load %arg2[%c0_45, %c0_46] : memref<8x128xf32, #tpu.memory_space<vmem>>, vector<8x128xf32>
    %96 = vector.shape_cast %94 : vector<8x1xi1> to vector<8x1xi1>
    %97 = vector.broadcast %96 : vector<8x1xi1> to vector<8x128xi1>
    %98 = vector.shape_cast %92 : vector<8x1xf32> to vector<8x1xf32>
    %99 = vector.broadcast %98 : vector<8x1xf32> to vector<8x128xf32>
    %100 = arith.select %97, %99, %95 : vector<8x128xi1>, vector<8x128xf32>
    %101 = arith.select %1, %100, %79 : vector<8x128xi1>, vector<8x128xf32>
    %cst_47 = arith.constant -1.000000e+00 : f32
    %cst_48 = arith.constant 1.000000e+00 : f32
    %102 = vector.broadcast %cst_47 : f32 to vector<8x128xf32>
    %103 = arith.maximumf %102, %101 : vector<8x128xf32>
    %104 = vector.broadcast %cst_48 : f32 to vector<8x128xf32>
    %105 = arith.minimumf %104, %103 : vector<8x128xf32>
    %106 = arith.mulf %105, %105 : vector<8x128xf32>
    %cst_49 = arith.constant dense<0.000000e+00> : vector<8xf32>
    %107 = vector.multi_reduction <add>, %106, %cst_49 [1] : vector<8x128xf32> to vector<8xf32>
    %108 = vector.shape_cast %107 : vector<8xf32> to vector<8x1xf32>
    %cst_50 = arith.constant 1.000000e-24 : f32
    %109 = vector.broadcast %cst_50 : f32 to vector<8x1xf32>
    %110 = arith.maximumf %108, %109 : vector<8x1xf32>
    %111 = math.rsqrt %110 : vector<8x1xf32>
    %112 = vector.broadcast %111 : vector<8x1xf32> to vector<8x128xf32>
    %113 = arith.mulf %105, %112 : vector<8x128xf32>
    %114 = arith.cmpf one, %113, %113 : vector<8x128xf32>
    %115 = arith.extui %114 : vector<8x128xi1> to vector<8x128xi32>
    %116 = arith.sitofp %115 : vector<8x128xi32> to vector<8x128xf32>
    %cst_51 = arith.constant dense<0xFF800000> : vector<8xf32>
    %117 = vector.multi_reduction <maximumf>, %116, %cst_51 [1] : vector<8x128xf32> to vector<8xf32>
    %118 = vector.shape_cast %117 : vector<8xf32> to vector<8x1xf32>
    %cst_52 = arith.constant 0.000000e+00 : f32
    %119 = vector.broadcast %cst_52 : f32 to vector<8x128xf32>
    %120 = arith.select %114, %119, %113 : vector<8x128xi1>, vector<8x128xf32>
    %c0_53 = arith.constant 0 : index
    %c0_54 = arith.constant 0 : index
    %121 = vector.load %arg13[%c0_53, %c0_54] : memref<8x128xf32, #tpu.memory_space<vmem>>, vector<8x128xf32>
    tpu.vector_store %arg13[%c0_53, %c0_54], %120 {strides = array<i32>} : memref<8x128xf32, #tpu.memory_space<vmem>>, vector<8x128xf32>,
    %122 = arith.maximumf %5, %118 : vector<8x1xf32>
    %c0_55 = arith.constant 0 : index
    %c0_56 = arith.constant 0 : index
    %123 = vector.load %arg15[%c0_55, %c0_56] : memref<8x1xf32, #tpu.memory_space<vmem>>, vector<8x1xf32>
    tpu.vector_store %arg15[%c0_55, %c0_56], %122 {strides = array<i32>} : memref<8x1xf32, #tpu.memory_space<vmem>>, vector<8x1xf32>,
    return
  }
  func.func @transform_0(%arg0: i32) -> (i32, i32) {
    %c0_i32 = arith.constant 0 : i32
    %c0_i32_0 = arith.constant 0 : i32
    return %arg0, %c0_i32 : i32, i32
  }
  func.func @transform_1(%arg0: i32) -> (i32, i32) {
    %c0_i32 = arith.constant 0 : i32
    %c0_i32_0 = arith.constant 0 : i32
    return %arg0, %c0_i32 : i32, i32
  }
  func.func @transform_2(%arg0: i32) -> (i32, i32) {
    %c0_i32 = arith.constant 0 : i32
    %c0_i32_0 = arith.constant 0 : i32
    %c0_i32_1 = arith.constant 0 : i32
    return %c0_i32, %c0_i32_0 : i32, i32
  }
  func.func @transform_3(%arg0: i32) -> (i32, i32) {
    %c0_i32 = arith.constant 0 : i32
    %c0_i32_0 = arith.constant 0 : i32
    %c0_i32_1 = arith.constant 0 : i32
    return %c0_i32, %c0_i32_0 : i32, i32
  }
  func.func @transform_4(%arg0: i32) -> (i32, i32) {
    %c0_i32 = arith.constant 0 : i32
    %c0_i32_0 = arith.constant 0 : i32
    %c0_i32_1 = arith.constant 0 : i32
    return %c0_i32, %c0_i32_0 : i32, i32
  }
  func.func @transform_5(%arg0: i32) -> (i32, i32) {
    %c0_i32 = arith.constant 0 : i32
    %c0_i32_0 = arith.constant 0 : i32
    %c0_i32_1 = arith.constant 0 : i32
    return %c0_i32, %c0_i32_0 : i32, i32
  }
  func.func @transform_6(%arg0: i32) -> (i32, i32) {
    %c0_i32 = arith.constant 0 : i32
    %c0_i32_0 = arith.constant 0 : i32
    %c0_i32_1 = arith.constant 0 : i32
    return %c0_i32, %c0_i32_0 : i32, i32
  }
  func.func @transform_7(%arg0: i32) -> (i32, i32) {
    %c0_i32 = arith.constant 0 : i32
    %c0_i32_0 = arith.constant 0 : i32
    %c0_i32_1 = arith.constant 0 : i32
    return %c0_i32, %c0_i32_0 : i32, i32
  }
  func.func @transform_8(%arg0: i32) -> (i32, i32) {
    %c0_i32 = arith.constant 0 : i32
    %c0_i32_0 = arith.constant 0 : i32
    %c0_i32_1 = arith.constant 0 : i32
    return %c0_i32, %c0_i32_0 : i32, i32
  }
  func.func @transform_9(%arg0: i32) -> (i32, i32) {
    %c0_i32 = arith.constant 0 : i32
    %c0_i32_0 = arith.constant 0 : i32
    %c0_i32_1 = arith.constant 0 : i32
    return %c0_i32, %c0_i32_0 : i32, i32
  }
  func.func @transform_10(%arg0: i32) -> (i32, i32) {
    %c0_i32 = arith.constant 0 : i32
    %c0_i32_0 = arith.constant 0 : i32
    %c0_i32_1 = arith.constant 0 : i32
    return %c0_i32, %c0_i32_0 : i32, i32
  }
  func.func @transform_11(%arg0: i32) -> (i32, i32) {
    %c0_i32 = arith.constant 0 : i32
    %c0_i32_0 = arith.constant 0 : i32
    %c0_i32_1 = arith.constant 0 : i32
    return %c0_i32, %c0_i32_0 : i32, i32
  }
  func.func @transform_12(%arg0: i32) -> (i32, i32) {
    %c0_i32 = arith.constant 0 : i32
    %c0_i32_0 = arith.constant 0 : i32
    return %arg0, %c0_i32 : i32, i32
  }
  func.func @transform_13(%arg0: i32) -> (i32, i32) {
    %c0_i32 = arith.constant 0 : i32
    %c0_i32_0 = arith.constant 0 : i32
    return %arg0, %c0_i32 : i32, i32
  }
  func.func @transform_14(%arg0: i32) -> (i32, i32) {
    %c0_i32 = arith.constant 0 : i32
    %c0_i32_0 = arith.constant 0 : i32
    return %arg0, %c0_i32 : i32, i32
  }
}

</mosaic_0001>

<bundles_post_ra>
// kernel: error_correction_forward.1
= control target key start
LH: loop header
LB: loop body
LE: loop exit
PB: predicated region body
PF: predicated region fallthrough
CT: control target
= control target key end

     0   :  { %s1055_s0 = inlined_call_operand.vmem [shape: f32[8,128], index: 0, kind: input, shape index: {}]   ;;  %s1056_s1 = inlined_call_operand.vmem [shape: f32[8,128], index: 1, kind: input, shape index: {}]   ;;  %s1057_s2 = inlined_call_operand.vmem [shape: bf16[128,128], index: 2, kind: input, shape index: {}]   ;;  %s1058_s3 = inlined_call_operand.vmem [shape: f32[1,128], index: 3, kind: input, shape index: {}]   ;;  %s1059_s4 = inlined_call_operand.vmem [shape: f32[1,128], index: 4, kind: input, shape index: {}]   ;;  %s1060_s5 = inlined_call_operand.<no memory space> [shape: f32[1,1], index: 5, kind: input, shape index: {}]   ;;  %s1061_s6 = inlined_call_operand.hbm [shape: bf16[128,128], index: 6, kind: input, shape index: {}]   ;;  %s1062_s7 = inlined_call_operand.vmem [shape: f32[1,128], index: 7, kind: input, shape index: {}]   ;;  %s1063_s8 = inlined_call_operand.vmem [shape: f32[1,128], index: 8, kind: input, shape index: {}]   ;;  %s1064_s9 = inlined_call_operand.vmem [shape: f32[1,128], index: 9, kind: input, shape index: {}]   ;;  %s1065_s10 = inlined_call_operand.hbm [shape: bf16[128,128], index: 10, kind: input, shape index: {}]   ;;  %s1066_s11 = inlined_call_operand.vmem [shape: f32[1,128], index: 11, kind: input, shape index: {}]   ;;  %s1067_s12 = inlined_call_operand.hbm [shape: f32[8,128], index: 12, kind: output, shape index: {0}]   ;;  %s1068_s13 = inlined_call_operand.vmem [shape: f32[8,1], index: 13, kind: output, shape index: {1}]   ;;  %s1069_s14 = inlined_call_operand.vmem [shape: f32[8,1], index: 14, kind: output, shape index: {2}]  }
   0x1   :  { %v20_v0 = vstv %s1060_s5 }
   0x2   :  { %21 = vst [vmem:[#allocation2] sm:$0x1] %v20_v0 }
   0x3   :  { %22 = vsyncpa [#allocation4], 0 }
   0x4   :  { %23 = vsyncpa [#allocation7], 0 }
   0x5   :  { %24 = vsyncpa [#allocation5], 0  ;;  %s793_s15 = smov [#allocation3]   ;;  %s721_s19 = scalar_lea.hbm %s1061_s6, 1024 }
   0x6   :  { %s42_s16 = sshll.u32 %s793_s15, 4  ;;  %p722_p0 = scmp.ne.s32.totalorder %s1061_s6, %s721_s19  ;;  %s43_s16 = int_to_ptr.vmem [resolvable:$true] %s42_s16 }
   0x7   :  { %p725_p1 = scmp.lt.u32.totalorder %s721_s19, %s1061_s6 }
   0x9   :  { %p727_p2 = pnand %p725_p1, %p722_p0 }
   0xb   :  { %730 = shalt.err (!%p727_p2)
}
   0xc   :  { %s731_s5 = scalar_lea.vmem %s43_s16, 1024  ;;  %p736_p4 = scmp.lt.s32.totalorder %s43_s16, %s43_s16 }
   0xd   :  { %p732_p3 = scmp.ne.s32.totalorder %s43_s16, %s731_s5  ;;  %p737_p5 = scmp.lt.s32.totalorder %s731_s5, %s731_s5 }
   0xf   :  { %p738_p6 = por %p737_p5, %p736_p4 }
  0x11   :  { %p739_p7 = pnand %p738_p6, %p732_p3 }
  0x13   :  { %742 = shalt.err (!%p739_p7)
}
  0x14   :  { %s794_s24 = smov 64   ;;  %s795_s25 = smov 4  }
  0x15   :  { %48 = dma.hbm_to_vmem [thread:$0]  %s1061_s6, 1024, %s43_s16, [#allocation4], %s794_s24, %s794_s24, %s795_s25  }
  0x16   :  { %s796_s28 = smov [#allocation6]   ;;  %s743_s17 = scalar_lea.hbm %s1065_s10, 1024 }
  0x17   :  { %s60_s29 = sshll.u32 %s796_s28, 4  ;;  %p744_p8 = scmp.ne.s32.totalorder %s1065_s10, %s743_s17  ;;  %s61_s29 = int_to_ptr.vmem [resolvable:$true] %s60_s29 }
  0x18   :  { %p747_p9 = scmp.lt.u32.totalorder %s743_s17, %s1065_s10 }
  0x1a   :  { %p749_p10 = pnand %p747_p9, %p744_p8 }
  0x1c   :  { %752 = shalt.err (!%p749_p10)
}
  0x1d   :  { %s753_s22 = scalar_lea.vmem %s61_s29, 1024  ;;  %p758_p12 = scmp.lt.s32.totalorder %s61_s29, %s61_s29 }
  0x1e   :  { %p754_p11 = scmp.ne.s32.totalorder %s61_s29, %s753_s22  ;;  %p759_p13 = scmp.lt.s32.totalorder %s753_s22, %s753_s22 }
  0x20   :  { %p760_p0 = por %p759_p13, %p758_p12 }
  0x22   :  { %p761_p1 = pnand %p760_p0, %p754_p11 }
  0x24   :  { %764 = shalt.err (!%p761_p1)
}
  0x25   :  { %66 = dma.hbm_to_vmem [thread:$0]  %s1065_s10, 1024, %s61_s29, [#allocation7], %s794_s24, %s794_s24, %s795_s25  }
  0x26   :  { %787 = dma.done.wait [#allocation4], 1024  }
  0x27   :  { %788 = vsyncadd [#allocation4], 4294966272 }
  0x28   :  { %789 = dma.done.wait [#allocation7], 1024  }
  0x29   :  { %790 = vsyncadd [#allocation7], 4294966272  ;;  %v797_v1 = vmov 0.0   ;;  %vm798_vm0 = vmmov 0   ;;  %v685_v2 = vld [vmem:[#allocation3] sm:$0xff]   ;;  %v686_v3 = vld [vmem:[#allocation3 + $0x8] sm:$0xff]   ;;  %v82_v13 = vlaneseq }
  0x2a   :  { %637 = vmatprep.subr.bf16.mxu1 %v797_v1  ;;  %653 = vmatprep.mubr.msk.bf16.mxu1 %vm798_vm0, %v797_v1  ;;  %v687_v4 = vld [vmem:[#allocation3 + $0x10] sm:$0xff]   ;;  %v688_v5 = vld [vmem:[#allocation3 + $0x18] sm:$0xff]   ;;  %v689_v6 = vld [vmem:[#allocation3 + $0x20] sm:$0xff]   ;;  %vm799_vm5 = vmmov 1   ;;  %vm229_vm9 = vcmask 7168  }
  0x2b   :  { %617 = vmatprep.subr.bf16.mxu0 %v797_v1  ;;  %633 = vmatprep.mubr.msk.bf16.mxu0 %vm798_vm0, %v797_v1  ;;  %v690_v7 = vld [vmem:[#allocation3 + $0x28] sm:$0xff]   ;;  %v917_v8 = vld [vmem:[%s1055_s0] sm:$0xff]  ;;  %v691_v9 = vld [vmem:[#allocation3 + $0x30] sm:$0xff]   ;;  %v940_v14 = vand.u32 127, %v82_v13 }
  0x2c   :  { %638 = vmatpush3.bf16.msra.mxu1 %v685_v2  ;;  %vm77_vm1 = vcmp.ne.f32.partialorder %v917_v8, %v917_v8  ;;  %v692_v10 = vld [vmem:[#allocation3 + $0x38] sm:$0xff]   ;;  %v558_v12 = vpack.c.bf16 %v917_v8, %v917_v8  ;;  %v694_v25 = vld [vmem:[%s1057_s2 + $0x8] sm:$0xff]   ;;  %v695_v26 = vld [vmem:[%s1057_s2 + $0x10] sm:$0xff]  }
  0x2d   :  { %639 = vmatprep.subr.bf16.mxu1 %v797_v1  ;;  %vm926_vm2 = vmneg %vm77_vm1  ;;  %v562_v15 = vld [vmem:[%s1062_s7] ss:$0 sm:$0xff]  ;;  %vm84_vm4 = vcmp.lt.s32.totalorder %v940_v14, 32  ;;  %v696_v27 = vld [vmem:[%s1057_s2 + $0x18] sm:$0xff]  }
  0x2e   :  { %vm557_vm3 = vmpackc.low %vm926_vm2, %vm926_vm2  ;;  %v545_v20 = vsel %vm84_vm4, 1.0, %v797_v1  ;;  %v693_v24 = vld [vmem:[%s1057_s2] sm:$0xff]   ;;  %v698_v29 = vld [vmem:[%s1057_s2 + $0x28] sm:$0xff]  }
  0x2f   :  { %618 = vmatpush3.bf16.msra.mxu0 %v693_v24  ;;  %v697_v28 = vld [vmem:[%s1057_s2 + $0x20] sm:$0xff]   ;;  %v699_v30 = vld [vmem:[%s1057_s2 + $0x30] sm:$0xff]   ;;  %v700_v31 = vld [vmem:[%s1057_s2 + $0x38] sm:$0xff]  }
  0x30   :  { %640 = vmatpush3.bf16.msra.mxu1 %v686_v3  ;;  %619 = vmatprep.subr.bf16.mxu0 %v797_v1  ;;  %v701_v32 = vld [vmem:[#allocation6] sm:$0xff]   ;;  %v702_v33 = vld [vmem:[#allocation6 + $0x8] sm:$0xff]   ;;  %v703_v39 = vld [vmem:[#allocation6 + $0x10] sm:$0xff]  }
  0x31   :  { %641 = vmatprep.subr.bf16.mxu1 %v797_v1  ;;  %v704_v40 = vld [vmem:[#allocation6 + $0x18] sm:$0xff]   ;;  %v705_v41 = vld [vmem:[#allocation6 + $0x20] sm:$0xff]   ;;  %v706_v42 = vld [vmem:[#allocation6 + $0x28] sm:$0xff]  }
  0x32   :  { %v707_v43 = vld [vmem:[#allocation6 + $0x30] sm:$0xff]   ;;  %v708_v44 = vld [vmem:[#allocation6 + $0x38] sm:$0xff]   ;;  %vm485_vm6 = vmxor %vm77_vm1, %vm799_vm5 }
  0x33   :  { %620 = vmatpush3.bf16.msra.mxu0 %v694_v25  ;;  %v576_v53 = vld [vmem:[%s1063_s8] ss:$0 sm:$0xff]  ;;  %vm1006_vm7 = vmand %vm485_vm6, %vm84_vm4 }
  0x34   :  { %642 = vmatpush3.bf16.msra.mxu1 %v687_v4  ;;  %621 = vmatprep.subr.bf16.mxu0 %v797_v1  ;;  %v577_v55 = vld [vmem:[%s1064_s9] ss:$0 sm:$0xff]  ;;  %v587_v60 = vsel %vm1006_vm7, 1.0, %v797_v1 }
  0x35   :  { %643 = vmatprep.subr.bf16.mxu1 %v797_v1  ;;  %489 = vadd.xlane.f32.xlu1 %v587_v60  ;;  %v578_v61 = vld [vmem:[%s1066_s11] ss:$0 sm:$0xff] }
  0x36   :  { %v546_v4 = vld [vmem:[%s1058_s3] ss:$0 sm:$0xff] }
  0x37   :  { %622 = vmatpush3.bf16.msra.mxu0 %v695_v26 }
  0x38   :  { %644 = vmatpush3.bf16.msra.mxu1 %v688_v5  ;;  %623 = vmatprep.subr.bf16.mxu0 %v797_v1 }
  0x39   :  { %645 = vmatprep.subr.bf16.mxu1 %v797_v1 }
  0x3b   :  { %624 = vmatpush3.bf16.msra.mxu0 %v696_v27 }
  0x3c   :  { %646 = vmatpush3.bf16.msra.mxu1 %v689_v6  ;;  %625 = vmatprep.subr.bf16.mxu0 %v797_v1 }
  0x3d   :  { %647 = vmatprep.subr.bf16.mxu1 %v797_v1 }
  0x3f   :  { %626 = vmatpush3.bf16.msra.mxu0 %v697_v28 }
  0x40   :  { %648 = vmatpush3.bf16.msra.mxu1 %v690_v7  ;;  %627 = vmatprep.subr.bf16.mxu0 %v797_v1 }
  0x41   :  { %649 = vmatprep.subr.bf16.mxu1 %v797_v1 }
  0x43   :  { %628 = vmatpush3.bf16.msra.mxu0 %v698_v29 }
  0x44   :  { %650 = vmatpush3.bf16.msra.mxu1 %v691_v9  ;;  %629 = vmatprep.subr.bf16.mxu0 %v797_v1 }
  0x45   :  { %651 = vmatprep.subr.bf16.mxu1 %v797_v1 }
  0x47   :  { %630 = vmatpush3.bf16.msra.mxu0 %v699_v30 }
  0x48   :  { %652 = vmatpush3.bf16.msra.mxu1 %v692_v10  ;;  %631 = vmatprep.subr.bf16.mxu0 %v797_v1  ;;  %v560_v10 = vld [vmem:[%s1059_s4] ss:$0 sm:$0xff]  ;;  %s800_s4 = smov [#allocation8]  }
  0x49   :  { %s526_s26 = sshll.u32 %s800_s4, 4  ;;  %s527_s26 = int_to_ptr.vmem [resolvable:$true] %s526_s26 }
  0x4a   :  { %s765_s27 = scalar_lea.vmem %s527_s26, 128  ;;  %p770_p3 = scmp.lt.s32.totalorder %s527_s26, %s527_s26 }
  0x4b   :  { %654 = vmatmul.mubr.msk.bf16.vlgmr.msra.gmra.mrb[0].mxu1 %vm557_vm3, %v558_v12  ;;  %632 = vmatpush3.bf16.msra.mxu0 %v700_v31  ;;  %p766_p2 = scmp.ne.s32.totalorder %s527_s26, %s765_s27  ;;  %p771_p4 = scmp.lt.s32.totalorder %s765_s27, %s765_s27 }
  0x4c   :  { %657 = vmatprep.subr.bf16.mxu0 %v797_v1 }
  0x4d   :  { %p772_p5 = por %p771_p4, %p770_p3 }
  0x4e   :  { %634 = vmatmul.mubr.msk.bf16.vlgmr.msra.gmra.mrb[0].mxu0 %vm557_vm3, %v558_v12 }
  0x4f   :  { %658 = vmatpush3.bf16.msra.mxu0 %v701_v32  ;;  %673 = vmatprep.mubr.msk.bf16.mxu0 %vm798_vm0, %v797_v1  ;;  %p773_p6 = pnand %p772_p5, %p766_p2 }
  0x50   :  { %659 = vmatprep.subr.bf16.mxu0 %v797_v1 }
  0x53   :  { %660 = vmatpush3.bf16.msra.mxu0 %v702_v33  ;;  %v544_v33 = vsel %vm77_vm1, 1.0, %v797_v1 }
  0x54   :  { %661 = vmatprep.subr.bf16.mxu0 %v797_v1 }
  0x57   :  { %662 = vmatpush3.bf16.msra.mxu0 %v703_v39 }
  0x58   :  { %663 = vmatprep.subr.bf16.mxu0 %v797_v1 }
  0x5b   :  { %664 = vmatpush3.bf16.msra.mxu0 %v704_v40 }
  0x5c   :  { %665 = vmatprep.subr.bf16.mxu0 %v797_v1 }
  0x5f   :  { %666 = vmatpush3.bf16.msra.mxu0 %v705_v41 }
  0x60   :  { %667 = vmatprep.subr.bf16.mxu0 %v797_v1 }
  0x63   :  { %668 = vmatpush3.bf16.msra.mxu0 %v706_v42 }
  0x64   :  { %669 = vmatprep.subr.bf16.mxu0 %v797_v1 }
  0x67   :  { %670 = vmatpush3.bf16.msra.mxu0 %v707_v43 }
  0x68   :  { %671 = vmatprep.subr.bf16.mxu0 %v797_v1 }
  0x6b   :  { %672 = vmatpush3.bf16.msra.mxu0 %v708_v44 }
  0xc2   :  { %v490_v12 = vpop.xlane.xlu1 %489 }
  0xc3   :  { %v494_v13 = vmax.f32 %v490_v12, 1.0  ;;  %vm497_vm8 = vcmp.gt.f32.partialorder %v490_v12, 0.0 }
 0x11e   :  { %v336_v16 = vpop.f32.mrb[0].mxu1 }
 0x11f   :  { %v337_v17 = vadd.f32 %v562_v15, %v336_v16  ;;  %v655_v18 = vpop.f32.mrb[1].mxu1  ;;  %v498_v15 = vld [vmem:[%s1056_s1] sm:$0xff] }
 0x120   :  { %v339_v19 = vpop.f32.mrb[2].mxu1  ;;  %v561_v18 = vld [vmem:[#allocation2] ss:$0 sm:$0xff] }
 0x121   :  { %v342_v21 = vmax.f32 %v337_v17, 0.0  ;;  %v656_v22 = vpop.f32.mrb[3].mxu1  ;;  %v194_v45 = vpop.f32.mrb[0].mxu0 }
 0x122   :  { %v635_v46 = vpop.f32.mrb[1].mxu0  ;;  %v195_v5 = vadd.f32 %v546_v4, %v194_v45 }
 0x123   :  { %v343_v23 = vmul.f32 %v545_v20, %v342_v21  ;;  %v197_v47 = vpop.f32.mrb[2].mxu0 }
 0x124   :  { %v636_v48 = vpop.f32.mrb[3].mxu0  ;;  %v200_v7 = vmax.f32 %v195_v5, 0.0 }
 0x125   :  { %344 = vadd.xlane.f32.xlu0 %v343_v23 }
 0x126   :  { %v208_v11 = vmul.f32 %v560_v10, %v200_v7 }
 0x1b2   :  { %v345_v34 = vpop.xlane.xlu0 %344 }
 0x1b3   :  { %v346_v35 = vmul.f32 0.03125, %v345_v34 }
 0x1b5   :  { %v347_v36 = vsub.f32 %v342_v21, %v346_v35 }
 0x1b7   :  { %v348_v37 = vmul.f32 %v347_v36, %v347_v36 }
 0x1b9   :  { %v349_v38 = vmul.f32 %v545_v20, %v348_v37 }
 0x1bb   :  { %350 = vadd.xlane.f32.xlu0 %v349_v38 }
 0x248   :  { %v351_v49 = vpop.xlane.xlu0 %350 }
 0x249   :  { %v352_v50 = vmul.f32 0.03125, %v351_v49 }
 0x24b   :  { %v353_v51 = vadd.f32 1e-05, %v352_v50 }
 0x24d   :  { %709 = vrsqrt.f32 %v353_v51 }
 0x257   :  { %v710_v52 = vpop.eup %709 }
 0x258   :  { %v355_v54 = vmul.f32 %v710_v52, %v347_v36 }
 0x25a   :  { %v363_v56 = vmul.f32 %v576_v53, %v355_v54 }
 0x25c   :  { %v371_v57 = vadd.f32 %v577_v55, %v363_v56 }
 0x25e   :  { %v372_v58 = vpack.c.bf16 %v371_v57, %v371_v57 }
 0x260   :  { %674 = vmatmul.mubr.bf16.vlgmr.msra.gmra.mrb[4].mxu0 %v372_v58 }
 0x333   :  { %v478_v62 = vpop.f32.mrb[4].mxu0 }
 0x334   :  { %v479_v63 = vadd.f32 %v578_v61, %v478_v62  ;;  %v675_v0 = vpop.f32.mrb[5].mxu0 }
 0x335   :  { %v481_v2 = vpop.f32.mrb[6].mxu0 }
 0x336   :  { %711 = vtanh.f32 %v479_v63  ;;  %v676_v3 = vpop.f32.mrb[7].mxu0 }
 0x337   :  { %713 = vrcp.f32 %v494_v13 }
 0x340   :  { %v712_v6 = vpop.eup %711 }
 0x341   :  { %v491_v9 = vsel %vm1006_vm7, %v712_v6, 0.0  ;;  %v714_v14 = vpop.eup %713 }
 0x342   :  { %492 = vadd.xlane.f32.xlu1 %v491_v9 }
 0x346   :  { %209 = vadd.xlane.f32.xlu1 %v208_v11 }
 0x3cf   :  { %v493_v16 = vpop.xlane.xlu1 %492 }
 0x3d0   :  { %v496_v17 = vmul.f32 %v714_v14, %v493_v16 }
 0x3d2   :  { %v501_v19 = vsel %vm497_vm8, %v496_v17, %v498_v15 }
 0x3d3   :  { %v210_v20 = vpop.xlane.xlu1 %209  ;;  %v502_v21 = vsel %vm77_vm1, %v501_v19, %v712_v6 }
 0x3d4   :  { %v218_v22 = vadd.f32 %v561_v18, %v210_v20  ;;  %v588_v23 = vclamps-f32 %v502_v21, 1.0 }
 0x3d6   :  { %v219_v24 = vand.u32 2147483647, %v218_v22  ;;  %v505_v25 = vmul.f32 %v588_v23, %v588_v23  ;;  %vm226_vm10 = vcmp.ge.f32.partialorder %v218_v22, 0.0 }
 0x3d8   :  { %v220_v26 = vsub.f32 0.0, %v219_v24  ;;  %506 = vadd.xlane.f32.xlu0 %v505_v25 }
 0x3da   :  { %v221_v27 = vmul.f32 1.442695, %v220_v26 }
 0x3dc   :  { %715 = vpow2.f32 %v221_v27  ;;  %80 = vmax.xlane.f32.xlu0 %v544_v33 }
 0x3e6   :  { %v716_v28 = vpop.eup %715 }
 0x3e7   :  { %v223_v29 = vadd.f32 1.0, %v716_v28 }
 0x3e9   :  { %717 = vrcp.f32 %v223_v29 }
 0x3f3   :  { %v718_v30 = vpop.eup %717 }
 0x3f4   :  { %v227_v31 = vmul.f32 %v718_v30, %v716_v28 }
 0x3f6   :  { %v228_v32 = vsel %vm226_vm10, %v718_v30, %v227_v31 }
 0x3f7   :  { %230 = vst.msk [vmem:[%s1068_s13] sm:$0xff] %vm229_vm9, %v228_v32 }
 0x465   :  { %v507_v34 = vpop.xlane.xlu0 %506 }
 0x466   :  { %v508_v35 = vmax.f32 %v507_v34, 1e-24 }
 0x468   :  { %719 = vrsqrt.f32 %v508_v35 }
 0x472   :  { %v720_v36 = vpop.eup %719 }
 0x473   :  { %v510_v37 = vmul.f32 %v720_v36, %v588_v23 }
 0x475   :  { %vm511_vm11 = vcmp.ne.f32.partialorder %v510_v37, %v510_v37 }
 0x476   :  { %v589_v38 = vsel %vm511_vm11, 1.0, %v797_v1  ;;  %v516_v39 = vsel %vm511_vm11, 0.0, %v510_v37 }
 0x477   :  { %514 = vmax.xlane.f32.xlu1 %v589_v38  ;;  %517 = vst [vmem:[#allocation8] sm:$0xff] %v516_v39 }
 0x478   :  { %776 = shalt.err (!%p773_p6)
}
 0x479   :  { %s777_s29 = scalar_lea.hbm %s1067_s12, 128 }
 0x47a   :  { %p778_p7 = scmp.ne.s32.totalorder %s1067_s12, %s777_s29  ;;  %p781_p8 = scmp.lt.u32.totalorder %s777_s29, %s1067_s12 }
 0x47c   :  { %p783_p9 = pnand %p781_p8, %p778_p7 }
 0x47e   :  { %786 = shalt.err (!%p783_p9)
}
 0x47f   :  { %529 = dma.vmem_to_hbm [thread:$0]  %s527_s26, 128, %s1067_s12, [#allocation5]   ;;  %v81_v1 = vpop.xlane.xlu0 %80 }
 0x504   :  { %v515_v8 = vpop.xlane.xlu1 %514 }
 0x505   :  { %v518_v40 = vmax.f32 %v81_v1, %v515_v8 }
 0x507   :  { %519 = vst.msk [vmem:[%s1069_s14] sm:$0xff] %vm229_vm9, %v518_v40 }
 0x508   :  { %791 = dma.done.wait [#allocation5], 128  }
 0x509   :  { %792 = vsyncadd [#allocation5], 4294967168 }
 0x50a   :  { %541 = vsyncpa [#allocation4], 1 }
 0x50b   :  { %542 = vsyncpa [#allocation7], 1 }
 0x50c   :  { %543 = vsyncpa [#allocation5], 1 }

</bundles_post_ra>
